<compile_context>
chip_gen: v7x
topology: tpu7x:2x2x1
jax: 0.10.0
libtpu: 0.0.40
codegen_flags: <defaults>
</compile_context>

<pallas_src>
import functools

import jax
import jax.numpy as jnp
from jax.experimental import pallas as pl
from jax.experimental.pallas import tpu as pltpu


_NEG = -1e30  # masks padded class lanes in the log-softmax


def _round_up(x, m):
    return (x + m - 1) // m * m


def _enriched_attention_kernel(hl_ref, qg_ref, whl_ref, wqg_ref, v_ref,
                               wo_ref, bo_ref, out_ref, *, hidden):
    """Additive attention + pooling + output Linear + LogSoftmax.

    hl_ref : [Bb, T, K1]  packed (h || l), zero-padded lanes; h = hl[:, :, :hidden]
    qg_ref : [Bb, K2]     packed (q || g), zero-padded lanes
    whl_ref: [K1, A]      stacked [w_h; w_l] (zero rows in the padding)
    wqg_ref: [K2, A]      stacked [w_q; w_g]
    v_ref  : [1, A]       attention score vector (row layout)
    wo_ref : [H, CP]      output weight, classes zero-padded to CP lanes
    bo_ref : [1, CP]      output bias, padded lanes set to a large negative
    out_ref: [Bb, CP]     log-probabilities (valid in the first C lanes)
    """
    hl = hl_ref[...].astype(jnp.float32)
    qg = qg_ref[...].astype(jnp.float32)
    Bb, T, K1 = hl.shape
    A = whl_ref.shape[1]

    # fused token projection: one MXU call for Wh*h_i + Wl*l_i
    u_tok = jnp.dot(hl.reshape(Bb * T, K1), whl_ref[...],
                    preferred_element_type=jnp.float32).reshape(Bb, T, A)
    # fused per-batch projection: one MXU call for Wq*q + Wg*g
    u_bat = jnp.dot(qg, wqg_ref[...], preferred_element_type=jnp.float32)   # [Bb, A]
    u = jnp.tanh(u_tok + u_bat[:, None, :])                                 # [Bb, T, A]

    # scores e_i = v^T u_i : VPU multiply + lane reduce (no N=1 MXU matmul)
    e = jnp.sum(u * v_ref[...], axis=-1, keepdims=True)                     # [Bb, T, 1]
    e = e - jnp.max(e, axis=1, keepdims=True)
    p = jnp.exp(e)
    alpha = p * pl.reciprocal(jnp.sum(p, axis=1, keepdims=True))            # [Bb, T, 1]

    # attention-weighted context; h lives in the first `hidden` lanes of hl
    ctx = jnp.sum(alpha * hl[:, :, :hidden], axis=1)                        # [Bb, H]

    # output Linear (lane-dense, class-padded) + LogSoftmax over classes
    logits = jnp.dot(ctx, wo_ref[...],
                     preferred_element_type=jnp.float32) + bo_ref[...]      # [Bb, CP]
    m = jnp.max(logits, axis=1, keepdims=True)
    lse = jnp.log(jnp.sum(jnp.exp(logits - m), axis=1, keepdims=True)) + m
    out_ref[...] = (logits - lse).astype(out_ref.dtype)


def enriched_attention_pallas(hl, qg, w_hl, w_qg, v_row, w_out_p, b_out_p,
                              *, hidden, batch_block=None):
    """Batch-gridded pallas_call over the packed operands."""
    B, T, K1 = hl.shape
    K2 = qg.shape[1]
    A = w_hl.shape[1]
    CP = w_out_p.shape[1]
    Bb = B if batch_block is None else min(batch_block, B)
    grid = (pl.cdiv(B, Bb),)
    kernel = functools.partial(_enriched_attention_kernel, hidden=hidden)
    return pl.pallas_call(
        kernel,
        out_shape=jax.ShapeDtypeStruct((B, CP), jnp.float32),
        grid=grid,
        in_specs=[
            pl.BlockSpec((Bb, T, K1), lambda b: (b, 0, 0)),   # hl   (streamed per batch block)
            pl.BlockSpec((Bb, K2), lambda b: (b, 0)),         # qg
            pl.BlockSpec((K1, A), lambda b: (0, 0)),          # stacked w_h;w_l
            pl.BlockSpec((K2, A), lambda b: (0, 0)),          # stacked w_q;w_g
            pl.BlockSpec((1, A), lambda b: (0, 0)),           # v (row layout)
            pl.BlockSpec((hidden, CP), lambda b: (0, 0)),     # w_out (class-padded)
            pl.BlockSpec((1, CP), lambda b: (0, 0)),          # b_out (class-padded)
        ],
        out_specs=pl.BlockSpec((Bb, CP), lambda b: (b, 0)),
        compiler_params=pltpu.CompilerParams(
            dimension_semantics=("parallel",)),
    )(hl, qg, w_hl, w_qg, v_row, w_out_p, b_out_p)


def pack_params(params, *, hidden, local_size, global_size, lane=128):
    """Stack & zero-pad the attention / output weights once, outside the jit."""
    A = params["w_h"].shape[1]
    C = params["w_out"].shape[1]
    k1 = hidden + local_size
    k2 = hidden + global_size
    K1 = _round_up(k1, lane)
    K2 = _round_up(k2, lane)
    CP = _round_up(C, lane)
    w_hl = jnp.zeros((K1, A), jnp.float32).at[:k1].set(
        jnp.concatenate([params["w_h"], params["w_l"]], axis=0))
    w_qg = jnp.zeros((K2, A), jnp.float32).at[:k2].set(
        jnp.concatenate([params["w_q"], params["w_g"]], axis=0))
    v_row = params["v"].T                                                    # [1, A]
    w_out_p = jnp.zeros((hidden, CP), jnp.float32).at[:, :C].set(params["w_out"])
    b_out_p = jnp.full((1, CP), _NEG, jnp.float32).at[:, :C].set(params["b_out"])
    return {"w_hl": w_hl, "w_qg": w_qg, "v_row": v_row,
            "w_out_p": w_out_p, "b_out_p": b_out_p}


@functools.partial(jax.jit, static_argnames=("num_classes",))
def forward(last_hidden_state, de1, de2, f, emb1, emb2, w_glob, packed,
            num_classes):
    """Glue (slicing, embedding gathers, global features, packing) + kernel,
    fused under one jit so the microsecond kernel isn't surrounded by
    separately dispatched tiny XLA ops."""
    q = last_hidden_state[:, 0, :]                                # [B, H] CLS query
    h = last_hidden_state[:, 1:-1, :]                             # [B, T, H]
    l = jnp.concatenate([emb1[de1], emb2[de2], f[:, :, None]], axis=-1)   # [B, T, L]
    g = jnp.tanh(jnp.mean(last_hidden_state, axis=1) @ w_glob)    # [B, G]

    B, T, H = h.shape
    K1 = packed["w_hl"].shape[0]
    K2 = packed["w_qg"].shape[0]
    hl = jnp.concatenate([h, l], axis=-1)
    hl = jnp.pad(hl, ((0, 0), (0, 0), (0, K1 - hl.shape[-1])))    # [B, T, K1]
    qg = jnp.concatenate([q, g], axis=-1)
    qg = jnp.pad(qg, ((0, 0), (0, K2 - qg.shape[-1])))            # [B, K2]

    out_p = enriched_attention_pallas(
        hl, qg, packed["w_hl"], packed["w_qg"], packed["v_row"],
        packed["w_out_p"], packed["b_out_p"], hidden=H)
    return out_p[:, :num_classes]


def reference_forward(h, q, l, g, params):
    """Pure-JAX reference for correctness checking."""
    u = jnp.tanh(jnp.einsum("bth,ha->bta", h, params["w_h"])
                 + jnp.einsum("btl,la->bta", l, params["w_l"])
                 + (q @ params["w_q"])[:, None, :]
                 + (g @ params["w_g"])[:, None, :])
    e = jnp.einsum("bta,ao->bt", u, params["v"])
    alpha = jax.nn.softmax(e, axis=1)
    ctx = jnp.einsum("bt,bth->bh", alpha, h)
    logits = ctx @ params["w_out"] + params["b_out"]
    return jax.nn.log_softmax(logits, axis=1)


if __name__ == "__main__":
    # --- sizes (small, consistent with the module's forward) ---
    B = 2                    # batch
    S = 10                   # padded subtoken length incl. CLS / EOS
    T = S - 2                # inner tokens attended over (h = X[:, 1:-1, :])
    H = 32                   # plm hidden_size
    C = 5                    # number_of_relations
    NUM_DIST = 20            # num_dependency_distance_embeddings
    DE = 8                   # dependency_distance_size
    L = 2 * DE + 1           # local feature size (emb(de1) ++ emb(de2) ++ f)
    G = 16                   # global feature size
    A = 32                   # attention hidden size

    key = jax.random.PRNGKey(0)
    keys = jax.random.split(key, 12)

    # --- stand-in PLM output and raw inputs ---
    last_hidden_state = jax.random.normal(keys[0], (B, S, H), jnp.float32)
    de1 = jax.random.randint(keys[1], (B, T), 0, NUM_DIST)
    de2 = jax.random.randint(keys[2], (B, T), 0, NUM_DIST)
    f = (jax.random.uniform(keys[3], (B, T)) > 0.5).astype(jnp.float32)

    # --- deterministic parameter init ---
    def init(k, shape, fan_in):
        return jax.random.normal(k, shape, jnp.float32) * (1.0 / jnp.sqrt(fan_in))

    emb1 = init(keys[4], (NUM_DIST, DE), DE)
    emb2 = init(keys[5], (NUM_DIST, DE), DE)
    w_glob = init(keys[6], (H, G), H)
    params = {
        "w_h": init(keys[7], (H, A), H),
        "w_q": init(keys[8], (H, A), H),
        "w_l": init(keys[9], (L, A), L),
        "w_g": init(keys[10], (G, A), G),
        "v": init(keys[11], (A, 1), A),
        "w_out": init(keys[0], (H, C), H),
        "b_out": jnp.zeros((1, C), jnp.float32),
    }

    # --- one-time weight packing, then the fully jitted forward ---
    packed = pack_params(params, hidden=H, local_size=L, global_size=G)
    out = forward(last_hidden_state, de1, de2, f, emb1, emb2, w_glob, packed,
                  num_classes=C)
    out = jax.block_until_ready(out)

    # --- pure-JAX reference on the unpacked operands ---
    q = last_hidden_state[:, 0, :]
    h = last_hidden_state[:, 1:-1, :]
    l = jnp.concatenate([emb1[de1], emb2[de2], f[:, :, None]], axis=-1)
    g = jnp.tanh(jnp.mean(last_hidden_state, axis=1) @ w_glob)
    ref = reference_forward(h, q, l, g, params)

    assert out.shape == (B, C)
    assert jnp.allclose(jnp.exp(out).sum(axis=1), 1.0, atol=1e-4)
    assert jnp.allclose(out, ref, atol=1e-4, rtol=1e-4)
    print("KERNEL_OK")
</pallas_src>

<mosaic_0001>
module attributes {stable_mosaic.version = 11 : i64} {
  func.func @_enriched_attention_kernel(%arg0: i32, %arg1: memref<2x8x128xf32, #tpu.memory_space<vmem>>, %arg2: memref<2x128xf32, #tpu.memory_space<vmem>>, %arg3: memref<128x32xf32, #tpu.memory_space<vmem>>, %arg4: memref<128x32xf32, #tpu.memory_space<vmem>>, %arg5: memref<1x32xf32, #tpu.memory_space<vmem>>, %arg6: memref<32x128xf32, #tpu.memory_space<vmem>>, %arg7: memref<1x128xf32, #tpu.memory_space<vmem>>, %arg8: memref<2x128xf32, #tpu.memory_space<vmem>>) attributes {dimension_semantics = [#tpu.dimension_semantics<parallel>], iteration_bounds = array<i64: 1>, scalar_prefetch = 0 : i64, scratch_operands = 0 : i64, tpu.core_type = #tpu.core_type<tc>, window_params = [{transform_indices = @transform_0, window_bounds = array<i64: 2, 8, 128>}, {transform_indices = @transform_1, window_bounds = array<i64: 2, 128>}, {pipeline_mode = #tpu.pipeline_mode<synchronous>, transform_indices = @transform_2, window_bounds = array<i64: 128, 32>}, {pipeline_mode = #tpu.pipeline_mode<synchronous>, transform_indices = @transform_3, window_bounds = array<i64: 128, 32>}, {pipeline_mode = #tpu.pipeline_mode<synchronous>, transform_indices = @transform_4, window_bounds = array<i64: 1, 32>}, {pipeline_mode = #tpu.pipeline_mode<synchronous>, transform_indices = @transform_5, window_bounds = array<i64: 32, 128>}, {pipeline_mode = #tpu.pipeline_mode<synchronous>, transform_indices = @transform_6, window_bounds = array<i64: 1, 128>}, {transform_indices = @transform_7, window_bounds = array<i64: 2, 128>}]} {
    %c0 = arith.constant 0 : index
    %c0_0 = arith.constant 0 : index
    %c0_1 = arith.constant 0 : index
    %0 = vector.load %arg1[%c0, %c0_0, %c0_1] : memref<2x8x128xf32, #tpu.memory_space<vmem>>, vector<2x8x128xf32>
    %c0_2 = arith.constant 0 : index
    %c0_3 = arith.constant 0 : index
    %1 = vector.load %arg2[%c0_2, %c0_3] : memref<2x128xf32, #tpu.memory_space<vmem>>, vector<2x128xf32>
    %2 = vector.shape_cast %0 : vector<2x8x128xf32> to vector<16x128xf32>
    %c0_4 = arith.constant 0 : index
    %c0_5 = arith.constant 0 : index
    %3 = vector.load %arg3[%c0_4, %c0_5] : memref<128x32xf32, #tpu.memory_space<vmem>>, vector<128x32xf32>
    %cst = arith.constant dense<0.000000e+00> : vector<16x32xf32>
    %4 = tpu.matmul %2, %3, %cst {dimension_numbers = #tpu.dot_dimension_numbers<[1], [0], [0], [1], [0, 0, 1, 1], [], []>} : vector<16x128xf32>, vector<128x32xf32>, vector<16x32xf32> -> vector<16x32xf32>
    %5 = vector.shape_cast %4 : vector<16x32xf32> to vector<2x8x32xf32>
    %c0_6 = arith.constant 0 : index
    %c0_7 = arith.constant 0 : index
    %6 = vector.load %arg4[%c0_6, %c0_7] : memref<128x32xf32, #tpu.memory_space<vmem>>, vector<128x32xf32>
    %cst_8 = arith.constant dense<0.000000e+00> : vector<2x32xf32>
    %7 = tpu.matmul %1, %6, %cst_8 {dimension_numbers = #tpu.dot_dimension_numbers<[1], [0], [0], [1], [0, 0, 1, 1], [], []>} : vector<2x128xf32>, vector<128x32xf32>, vector<2x32xf32> -> vector<2x32xf32>
    %8 = vector.shape_cast %7 : vector<2x32xf32> to vector<2x1x32xf32>
    %9 = vector.broadcast %8 : vector<2x1x32xf32> to vector<2x8x32xf32>
    %10 = arith.addf %5, %9 : vector<2x8x32xf32>
    %11 = math.tanh %10 : vector<2x8x32xf32>
    %c0_9 = arith.constant 0 : index
    %c0_10 = arith.constant 0 : index
    %12 = vector.load %arg5[%c0_9, %c0_10] : memref<1x32xf32, #tpu.memory_space<vmem>>, vector<1x32xf32>
    %13 = vector.shape_cast %12 : vector<1x32xf32> to vector<1x1x32xf32>
    %14 = vector.broadcast %13 : vector<1x1x32xf32> to vector<2x8x32xf32>
    %15 = arith.mulf %11, %14 : vector<2x8x32xf32>
    %cst_11 = arith.constant dense<0.000000e+00> : vector<2x8xf32>
    %16 = vector.multi_reduction <add>, %15, %cst_11 [2] : vector<2x8x32xf32> to vector<2x8xf32>
    %17 = vector.shape_cast %16 : vector<2x8xf32> to vector<2x8x1xf32>
    %cst_12 = arith.constant dense<0xFF800000> : vector<2x1xf32>
    %18 = vector.multi_reduction <maximumf>, %17, %cst_12 [1] : vector<2x8x1xf32> to vector<2x1xf32>
    %19 = vector.shape_cast %18 : vector<2x1xf32> to vector<2x1x1xf32>
    %20 = vector.broadcast %19 : vector<2x1x1xf32> to vector<2x8x1xf32>
    %21 = arith.subf %17, %20 : vector<2x8x1xf32>
    %22 = math.exp %21 : vector<2x8x1xf32>
    %cst_13 = arith.constant dense<0.000000e+00> : vector<2x1xf32>
    %23 = vector.multi_reduction <add>, %22, %cst_13 [1] : vector<2x8x1xf32> to vector<2x1xf32>
    %24 = vector.shape_cast %23 : vector<2x1xf32> to vector<2x1x1xf32>
    %25 = tpu.reciprocal %24 : vector<2x1x1xf32> -> vector<2x1x1xf32>
    %26 = vector.broadcast %25 : vector<2x1x1xf32> to vector<2x8x1xf32>
    %27 = arith.mulf %22, %26 : vector<2x8x1xf32>
    %28 = vector.extract_strided_slice %0 {offsets = [0, 0, 0], sizes = [2, 8, 32], strides = [1, 1, 1]} : vector<2x8x128xf32> to vector<2x8x32xf32>
    %29 = vector.broadcast %27 : vector<2x8x1xf32> to vector<2x8x32xf32>
    %30 = arith.mulf %29, %28 : vector<2x8x32xf32>
    %cst_14 = arith.constant dense<0.000000e+00> : vector<2x32xf32>
    %31 = vector.multi_reduction <add>, %30, %cst_14 [1] : vector<2x8x32xf32> to vector<2x32xf32>
    %c0_15 = arith.constant 0 : index
    %c0_16 = arith.constant 0 : index
    %32 = vector.load %arg6[%c0_15, %c0_16] : memref<32x128xf32, #tpu.memory_space<vmem>>, vector<32x128xf32>
    %cst_17 = arith.constant dense<0.000000e+00> : vector<2x128xf32>
    %33 = tpu.matmul %31, %32, %cst_17 {dimension_numbers = #tpu.dot_dimension_numbers<[1], [0], [0], [1], [0, 0, 1, 1], [], []>} : vector<2x32xf32>, vector<32x128xf32>, vector<2x128xf32> -> vector<2x128xf32>
    %c0_18 = arith.constant 0 : index
    %c0_19 = arith.constant 0 : index
    %34 = vector.load %arg7[%c0_18, %c0_19] : memref<1x128xf32, #tpu.memory_space<vmem>>, vector<1x128xf32>
    %35 = vector.broadcast %34 : vector<1x128xf32> to vector<2x128xf32>
    %36 = arith.addf %33, %35 : vector<2x128xf32>
    %cst_20 = arith.constant dense<0xFF800000> : vector<2xf32>
    %37 = vector.multi_reduction <maximumf>, %36, %cst_20 [1] : vector<2x128xf32> to vector<2xf32>
    %38 = vector.shape_cast %37 : vector<2xf32> to vector<2x1xf32>
    %39 = vector.broadcast %38 : vector<2x1xf32> to vector<2x128xf32>
    %40 = arith.subf %36, %39 : vector<2x128xf32>
    %41 = math.exp %40 : vector<2x128xf32>
    %cst_21 = arith.constant dense<0.000000e+00> : vector<2xf32>
    %42 = vector.multi_reduction <add>, %41, %cst_21 [1] : vector<2x128xf32> to vector<2xf32>
    %43 = vector.shape_cast %42 : vector<2xf32> to vector<2x1xf32>
    %44 = math.log %43 : vector<2x1xf32>
    %45 = arith.addf %44, %38 : vector<2x1xf32>
    %46 = vector.broadcast %45 : vector<2x1xf32> to vector<2x128xf32>
    %47 = arith.subf %36, %46 : vector<2x128xf32>
    %c0_22 = arith.constant 0 : index
    %c0_23 = arith.constant 0 : index
    %48 = vector.load %arg8[%c0_22, %c0_23] : memref<2x128xf32, #tpu.memory_space<vmem>>, vector<2x128xf32>
    tpu.vector_store %arg8[%c0_22, %c0_23], %47 {strides = array<i32>} : memref<2x128xf32, #tpu.memory_space<vmem>>, vector<2x128xf32>,
    return
  }
  func.func @transform_0(%arg0: i32) -> (i32, i32, i32) {
    %c0_i32 = arith.constant 0 : i32
    %c0_i32_0 = arith.constant 0 : i32
    %c0_i32_1 = arith.constant 0 : i32
    return %arg0, %c0_i32, %c0_i32_0 : i32, i32, i32
  }
  func.func @transform_1(%arg0: i32) -> (i32, i32) {
    %c0_i32 = arith.constant 0 : i32
    %c0_i32_0 = arith.constant 0 : i32
    return %arg0, %c0_i32 : i32, i32
  }
  func.func @transform_2(%arg0: i32) -> (i32, i32) {
    %c0_i32 = arith.constant 0 : i32
    %c0_i32_0 = arith.constant 0 : i32
    %c0_i32_1 = arith.constant 0 : i32
    return %c0_i32, %c0_i32_0 : i32, i32
  }
  func.func @transform_3(%arg0: i32) -> (i32, i32) {
    %c0_i32 = arith.constant 0 : i32
    %c0_i32_0 = arith.constant 0 : i32
    %c0_i32_1 = arith.constant 0 : i32
    return %c0_i32, %c0_i32_0 : i32, i32
  }
  func.func @transform_4(%arg0: i32) -> (i32, i32) {
    %c0_i32 = arith.constant 0 : i32
    %c0_i32_0 = arith.constant 0 : i32
    %c0_i32_1 = arith.constant 0 : i32
    return %c0_i32, %c0_i32_0 : i32, i32
  }
  func.func @transform_5(%arg0: i32) -> (i32, i32) {
    %c0_i32 = arith.constant 0 : i32
    %c0_i32_0 = arith.constant 0 : i32
    %c0_i32_1 = arith.constant 0 : i32
    return %c0_i32, %c0_i32_0 : i32, i32
  }
  func.func @transform_6(%arg0: i32) -> (i32, i32) {
    %c0_i32 = arith.constant 0 : i32
    %c0_i32_0 = arith.constant 0 : i32
    %c0_i32_1 = arith.constant 0 : i32
    return %c0_i32, %c0_i32_0 : i32, i32
  }
  func.func @transform_7(%arg0: i32) -> (i32, i32) {
    %c0_i32 = arith.constant 0 : i32
    %c0_i32_0 = arith.constant 0 : i32
    return %arg0, %c0_i32 : i32, i32
  }
}

</mosaic_0001>

<bundles_post_ra>
// kernel: forward.1
= control target key start
LH: loop header
LB: loop body
LE: loop exit
PB: predicated region body
PF: predicated region fallthrough
CT: control target
= control target key end

     0   :  { %v657_v3 = vmov 0.0|0.0   ;;  %vm658_vm0 = vmmov 0   ;;  %v659_v8 = vmov 0.0   ;;  %s864_s0 = inlined_call_operand.vmem [shape: f32[2,8,128], index: 0, kind: input, shape index: {}]   ;;  %s865_s1 = inlined_call_operand.vmem [shape: f32[2,128], index: 1, kind: input, shape index: {}]   ;;  %s866_s2 = inlined_call_operand.vmem [shape: f32[128,32], index: 2, kind: input, shape index: {}]   ;;  %s867_s3 = inlined_call_operand.vmem [shape: f32[128,32], index: 3, kind: input, shape index: {}]   ;;  %s868_s4 = inlined_call_operand.vmem [shape: f32[1,32], index: 4, kind: input, shape index: {}]   ;;  %s869_s5 = inlined_call_operand.vmem [shape: f32[32,128], index: 5, kind: input, shape index: {}]   ;;  %s870_s6 = inlined_call_operand.vmem [shape: f32[1,128], index: 6, kind: input, shape index: {}]   ;;  %s871_s7 = inlined_call_operand.hbm [shape: f32[2,128], index: 7, kind: output, shape index: {}]  }
   0x1   :  { %v121_v0 = vld [vmem:[%s867_s3] sm:$0xff]  ;;  %v122_v1 = vld [vmem:[%s867_s3 + $0x8] sm:$0xff]  ;;  %582 = vmatprep.subr.bf16.mxu1 %v657_v3  ;;  %v123_v6 = vld [vmem:[%s867_s3 + $0x10] sm:$0xff]  ;;  %536 = vmatprep.mubr.msk.f32.mxu1 %vm658_vm0, %v659_v8 }
   0x2   :  { %v30_v2 = vld [vmem:[%s866_s2] sm:$0xff]  ;;  %v583_v4 = vpack.c.bf16 %v122_v1, %v121_v0  ;;  %v31_v5 = vld [vmem:[%s866_s2 + $0x8] sm:$0xff]  ;;  %v124_v7 = vld [vmem:[%s867_s3 + $0x18] sm:$0xff] }
   0x3   :  { %v550_v9 = vpack.c.bf16 %v31_v5, %v30_v2  ;;  %v32_v10 = vld [vmem:[%s866_s2 + $0x10] sm:$0xff]  ;;  %v33_v11 = vld [vmem:[%s866_s2 + $0x18] sm:$0xff]  ;;  %v586_v12 = vpack.c.bf16 %v124_v7, %v123_v6  ;;  %v34_v14 = vld [vmem:[%s866_s2 + $0x20] sm:$0xff] }
   0x4   :  { %584 = vmatpush3.bf16.msra.mxu1 %v583_v4  ;;  %v554_v13 = vpack.c.bf16 %v33_v11, %v32_v10  ;;  %v35_v15 = vld [vmem:[%s866_s2 + $0x28] sm:$0xff]  ;;  %v125_v16 = vld [vmem:[%s867_s3 + $0x20] sm:$0xff]  ;;  %v36_v20 = vld [vmem:[%s866_s2 + $0x30] sm:$0xff] }
   0x5   :  { %551 = vmatprep.subr.bf16.mxu0 %v550_v9  ;;  %585 = vmatprep.subr.bf16.mxu1 %v657_v3  ;;  %v126_v17 = vld [vmem:[%s867_s3 + $0x28] sm:$0xff]  ;;  %v558_v18 = vpack.c.bf16 %v35_v15, %v34_v14  ;;  %v37_v21 = vld [vmem:[%s866_s2 + $0x38] sm:$0xff]  ;;  %v127_v22 = vld [vmem:[%s867_s3 + $0x30] sm:$0xff] }
   0x6   :  { %553 = vmatpush3.bf16.msra.mxu0 %v550_v9  ;;  %v589_v19 = vpack.c.bf16 %v126_v17, %v125_v16  ;;  %v128_v23 = vld [vmem:[%s867_s3 + $0x38] sm:$0xff]  ;;  %v562_v24 = vpack.c.bf16 %v37_v21, %v36_v20  ;;  %v38_v25 = vld [vmem:[%s866_s2 + $0x40] sm:$0xff]  ;;  %v39_v27 = vld [vmem:[%s866_s2 + $0x48] sm:$0xff] }
   0x7   :  { %555 = vmatprep.subr.bf16.mxu0 %v554_v13  ;;  %v592_v26 = vpack.c.bf16 %v128_v23, %v127_v22  ;;  %v764_v28 = vld [vmem:[%s864_s0] sm:$0xff] }
   0x8   :  { %587 = vmatpush3.bf16.msra.mxu1 %v586_v12 }
   0x9   :  { %588 = vmatprep.subr.bf16.mxu1 %v657_v3 }
   0xa   :  { %557 = vmatpush3.bf16.msra.mxu0 %v554_v13 }
   0xb   :  { %559 = vmatprep.subr.bf16.mxu0 %v558_v18 }
   0xc   :  { %590 = vmatpush3.bf16.msra.mxu1 %v589_v19 }
   0xd   :  { %12 = vsyncpa [#allocation3], 0  ;;  %591 = vmatprep.subr.bf16.mxu1 %v657_v3  ;;  %v129_v29 = vld [vmem:[%s867_s3 + $0x40] sm:$0xff]  ;;  %v130_v30 = vld [vmem:[%s867_s3 + $0x48] sm:$0xff]  ;;  %501 = vmatprep.mubr.f32.mxu0 %v764_v28  ;;  %v566_v31 = vpack.c.bf16 %v39_v27, %v38_v25  ;;  %v660_v53 = vmov 1966171168   ;;  %v211_v55 = vlaneseq }
   0xe   :  { %561 = vmatpush3.bf16.msra.mxu0 %v558_v18  ;;  %v595_v32 = vpack.c.bf16 %v130_v30, %v129_v29  ;;  %v40_v33 = vld [vmem:[%s866_s2 + $0x50] sm:$0xff]  ;;  %v41_v34 = vld [vmem:[%s866_s2 + $0x58] sm:$0xff]  ;;  %v42_v39 = vld [vmem:[%s866_s2 + $0x60] sm:$0xff]  ;;  %v209_v54 = vunpack.c.l.s4 %v660_v53  ;;  %vm253_vm1 = vcmask 261120   ;;  %vm323_vm2 = vcmask 1041409   ;;  %s661_s8 = smov [#allocation2]  }
   0xf   :  { %563 = vmatprep.subr.bf16.mxu0 %v562_v24  ;;  %v131_v35 = vld [vmem:[%s867_s3 + $0x50] sm:$0xff]  ;;  %v132_v36 = vld [vmem:[%s867_s3 + $0x58] sm:$0xff]  ;;  %v570_v37 = vpack.c.bf16 %v41_v34, %v40_v33  ;;  %v43_v40 = vld [vmem:[%s866_s2 + $0x68] sm:$0xff]  ;;  %v212_v57 = vshrl.u32 %v211_v55, 7  ;;  %vm397_vm3 = vcmask 1041408   ;;  %s418_s9 = sshll.u32 %s661_s8, 4  ;;  %s419_s9 = int_to_ptr.vmem [resolvable:$true] %s418_s9 }
  0x10   :  { %593 = vmatpush3.bf16.msra.mxu1 %v592_v26  ;;  %v598_v38 = vpack.c.bf16 %v132_v36, %v131_v35  ;;  %v133_v41 = vld [vmem:[%s867_s3 + $0x60] sm:$0xff]  ;;  %v134_v42 = vld [vmem:[%s867_s3 + $0x68] sm:$0xff]  ;;  %v574_v43 = vpack.c.bf16 %v43_v40, %v42_v39  ;;  %v44_v45 = vld [vmem:[%s866_s2 + $0x70] sm:$0xff]  ;;  %v210_v56 = vunpack.c.0.s8 %v209_v54  ;;  %p638_p1 = scmp.lt.s32.totalorder %s419_s9, %s419_s9 }
  0x11   :  { %594 = vmatprep.subr.bf16.mxu1 %v657_v3  ;;  %v601_v44 = vpack.c.bf16 %v134_v42, %v133_v41  ;;  %v45_v46 = vld [vmem:[%s866_s2 + $0x78] sm:$0xff]  ;;  %v135_v47 = vld [vmem:[%s867_s3 + $0x70] sm:$0xff]  ;;  %v29_v51 = vld [vmem:[%s865_s1] sm:$0x3]  ;;  %v232_v62 = vsub.s32 0, %v212_v57 }
  0x12   :  { %565 = vmatpush3.bf16.msra.mxu0 %v562_v24  ;;  %v136_v48 = vld [vmem:[%s867_s3 + $0x78] sm:$0xff]  ;;  %v578_v49 = vpack.c.bf16 %v45_v46, %v44_v45  ;;  %v820_v52 = vld [vmem:[%s864_s0 + $0x8] sm:$0xff]  ;;  %v213_v58 = vsub.s32 %v210_v56, %v212_v57  ;;  %v310_v16 = vld [vmem:[%s869_s5] sm:$0xff] }
  0x13   :  { %567 = vmatprep.subr.bf16.mxu0 %v566_v31  ;;  %v604_v50 = vpack.c.bf16 %v136_v48, %v135_v47  ;;  %v311_v17 = vld [vmem:[%s869_s5 + $0x8] sm:$0xff]  ;;  %v312_v18 = vld [vmem:[%s869_s5 + $0x10] sm:$0xff]  ;;  %v313_v20 = vld [vmem:[%s869_s5 + $0x18] sm:$0xff] }
  0x14   :  { %596 = vmatpush3.bf16.msra.mxu1 %v595_v32  ;;  %v607_v19 = vpack.c.bf16 %v311_v17, %v310_v16  ;;  %v610_v21 = vpack.c.bf16 %v313_v20, %v312_v18 }
  0x15   :  { %597 = vmatprep.subr.bf16.mxu1 %v657_v3 }
  0x16   :  { %569 = vmatpush3.bf16.msra.mxu0 %v566_v31 }
  0x17   :  { %571 = vmatprep.subr.bf16.mxu0 %v570_v37 }
  0x18   :  { %599 = vmatpush3.bf16.msra.mxu1 %v598_v38 }
  0x19   :  { %600 = vmatprep.subr.bf16.mxu1 %v657_v3 }
  0x1a   :  { %573 = vmatpush3.bf16.msra.mxu0 %v570_v37 }
  0x1b   :  { %575 = vmatprep.subr.bf16.mxu0 %v574_v43 }
  0x1c   :  { %602 = vmatpush3.bf16.msra.mxu1 %v601_v44 }
  0x1d   :  { %603 = vmatprep.subr.bf16.mxu1 %v657_v3 }
  0x1e   :  { %577 = vmatpush3.bf16.msra.mxu0 %v574_v43 }
  0x1f   :  { %579 = vmatprep.subr.bf16.mxu0 %v578_v49 }
  0x20   :  { %605 = vmatpush3.bf16.msra.mxu1 %v604_v50 }
  0x22   :  { %581 = vmatpush3.bf16.msra.mxu0 %v578_v49 }
  0x23   :  { %537 = vmatmul.mubr.f32.vlgmr.msra.gmra.mrb[0].mxu1 %v29_v51  ;;  %606 = vmatprep.subr.bf16.mxu0 %v657_v3 }
  0x25   :  { %502 = vmatmul.mubr.f32.vlgmr.msra.gmra.mrb[0].mxu0 %v820_v52 }
  0x26   :  { %547 = vmatprep.mubr.msk.f32.mxu0 %vm658_vm0, %v659_v8  ;;  %v426_v8 = vld [vmem:[%s868_s4] ss:$0 sm:$0xff]  ;;  %608 = vmatpush3.bf16.msra.mxu0 %v607_v19 }
  0x27   :  { %609 = vmatprep.subr.bf16.mxu0 %v657_v3 }
  0x2a   :  { %611 = vmatpush3.bf16.msra.mxu0 %v610_v21 }
  0xf6   :  { %v203_v59 = vpop.f32.mrb[0].mxu1 }
  0xf7   :  { %v214_v60 = vrot.slane %v203_v59, %v213_v58  ;;  %v538_v61 = vpop.f32.mrb[1].mxu1 }
  0xf8   :  { %v503_v63 = vpop.f32.mrb[0].mxu0 }
  0xf9   :  { %v215_v0 = vcombine.high %v214_v60, %v214_v60  ;;  %v222_v1 = vrot.slane %v214_v60, %v213_v58  ;;  %v112_v2 = vpop.f32.mrb[1].mxu0 }
  0xfb   :  { %v229_v4 = vrot.slane %v215_v0, %v213_v58  ;;  %v233_v5 = vrot.slane %v222_v1, %v232_v62 }
  0xfd   :  { %v237_v6 = vrot.slane %v229_v4, %v232_v62  ;;  %v240_v7 = vadd.f32 %v233_v5, %v112_v2 }
  0xff   :  { %v241_v9 = vadd.f32 %v503_v63, %v237_v6  ;;  %617 = vtanh.f32 %v240_v7 }
 0x101   :  { %619 = vtanh.f32 %v241_v9 }
 0x109   :  { %v618_v10 = vpop.eup %617 }
 0x10a   :  { %v251_v11 = vmul.f32 %v618_v10, %v426_v8 }
 0x10b   :  { %v620_v12 = vpop.eup %619 }
 0x10c   :  { %v254_v13 = vsel %vm253_vm1, %v251_v11, 0.0  ;;  %v252_v14 = vmul.f32 %v620_v12, %v426_v8 }
 0x10d   :  { %255 = vadd.xlane.f32.xlu0 %v254_v13 }
 0x10e   :  { %v257_v15 = vsel %vm253_vm1, %v252_v14, 0.0 }
 0x111   :  { %258 = vadd.xlane.f32.xlu0 %v257_v15 }
 0x19a   :  { %v256_v22 = vpop.xlane.xlu0 %255 }
 0x19b   :  { %v260_v23 = vrot.slane %v256_v22, 4 }
 0x19d   :  { %v261_v24 = vmax.f32 %v256_v22, %v260_v23 }
 0x19e   :  { %v259_v25 = vpop.xlane.xlu0 %258 }
 0x19f   :  { %v262_v26 = vrot.slane %v261_v24, 2  ;;  %v266_v27 = vrot.slane %v259_v25, 4 }
 0x1a1   :  { %v263_v29 = vmax.f32 %v261_v24, %v262_v26  ;;  %v267_v30 = vmax.f32 %v259_v25, %v266_v27 }
 0x1a3   :  { %v264_v31 = vrot.slane %v263_v29, 1  ;;  %v268_v32 = vrot.slane %v267_v30, 2 }
 0x1a5   :  { %v265_v33 = vmax.f32 %v263_v29, %v264_v31  ;;  %v269_v34 = vmax.f32 %v267_v30, %v268_v32 }
 0x1a7   :  { %v272_v35 = vsub.f32 %v256_v22, %v265_v33  ;;  %v270_v36 = vrot.slane %v269_v34, 1 }
 0x1a9   :  { %v274_v37 = vmul.f32 1.442695, %v272_v35  ;;  %v271_v38 = vmax.f32 %v269_v34, %v270_v36 }
 0x1ab   :  { %621 = vpow2.f32 %v274_v37  ;;  %v273_v39 = vsub.f32 %v259_v25, %v271_v38 }
 0x1ad   :  { %v276_v3 = vmul.f32 1.442695, %v273_v39 }
 0x1af   :  { %623 = vpow2.f32 %v276_v3 }
 0x1b5   :  { %v622_v40 = vpop.eup %621 }
 0x1b6   :  { %v278_v41 = vrot.slane %v622_v40, 4 }
 0x1b8   :  { %v279_v42 = vadd.f32 %v622_v40, %v278_v41 }
 0x1b9   :  { %v624_v43 = vpop.eup %623 }
 0x1ba   :  { %v280_v44 = vrot.slane %v279_v42, 2  ;;  %v284_v45 = vrot.slane %v624_v43, 4 }
 0x1bc   :  { %v281_v46 = vadd.f32 %v280_v44, %v279_v42  ;;  %v285_v47 = vadd.f32 %v624_v43, %v284_v45 }
 0x1be   :  { %v286_v48 = vrot.slane %v285_v47, 2  ;;  %v282_v49 = vrot.slane %v281_v46, 1 }
 0x1c0   :  { %v287_v50 = vadd.f32 %v286_v48, %v285_v47  ;;  %v283_v51 = vadd.f32 %v282_v49, %v281_v46 }
 0x1c2   :  { %v288_v53 = vrot.slane %v287_v50, 1  ;;  %625 = vrcp.f32 %v283_v51 }
 0x1c4   :  { %v289_v54 = vadd.f32 %v288_v53, %v287_v50 }
 0x1c6   :  { %627 = vrcp.f32 %v289_v54 }
 0x1cc   :  { %v626_v55 = vpop.eup %625 }
 0x1cd   :  { %v292_v56 = vmul.f32 %v626_v55, %v622_v40 }
 0x1cf   :  { %v294_v57 = vmul.f32 %v292_v56, %v764_v28 }
 0x1d0   :  { %v628_v58 = vpop.eup %627 }
 0x1d1   :  { %v293_v59 = vmul.f32 %v628_v58, %v624_v43  ;;  %v296_v60 = vsel %vm253_vm1, %v294_v57, 0.0 }
 0x1d2   :  { %v297_v61 = vrot.slane %v296_v60, 4 }
 0x1d3   :  { %v295_v62 = vmul.f32 %v293_v59, %v820_v52  ;;  %v427_v52 = vld [vmem:[%s870_s6] ss:$0 sm:$0xff]  ;;  %s633_s6 = scalar_lea.vmem %s419_s9, 32 }
 0x1d4   :  { %v298_v63 = vadd.f32 %v297_v61, %v296_v60  ;;  %p634_p0 = scmp.ne.s32.totalorder %s419_s9, %s633_s6  ;;  %p639_p2 = scmp.lt.s32.totalorder %s633_s6, %s633_s6 }
 0x1d5   :  { %v303_v0 = vsel %vm253_vm1, %v295_v62, 0.0 }
 0x1d6   :  { %v299_v1 = vrot.slane %v298_v63, 2  ;;  %v304_v2 = vrot.slane %v303_v0, 4  ;;  %p640_p3 = por %p639_p2, %p638_p1 }
 0x1d8   :  { %v300_v4 = vadd.f32 %v299_v1, %v298_v63  ;;  %v305_v5 = vadd.f32 %v304_v2, %v303_v0  ;;  %p641_p4 = pnand %p640_p3, %p634_p0 }
 0x1da   :  { %v306_v6 = vrot.slane %v305_v5, 2  ;;  %v301_v7 = vrot.slane %v300_v4, 1 }
 0x1dc   :  { %v307_v9 = vadd.f32 %v306_v6, %v305_v5  ;;  %v302_v28 = vadd.f32 %v301_v7, %v300_v4 }
 0x1de   :  { %v308_v8 = vrot.slane %v307_v9, 1 }
 0x1e0   :  { %v309_v10 = vadd.f32 %v308_v8, %v307_v9 }
 0x1e2   :  { %v324_v11 = vsel %vm323_vm2, %v309_v10, %v302_v28 }
 0x1e3   :  { %548 = vmatmul.mubr.msk.f32.vlgmr.msra.gmra.mrb[2].mxu0 %vm253_vm1, %v324_v11 }
 0x2b6   :  { %v393_v12 = vpop.f32.mrb[2].mxu0 }
 0x2b7   :  { %v394_v13 = vadd.f32 %v427_v52, %v393_v12  ;;  %v549_v14 = vpop.f32.mrb[3].mxu0 }
 0x2b9   :  { %v398_v15 = vsel %vm397_vm3, %v394_v13, -inf }
 0x2ba   :  { %399 = vmax.xlane.f32.xlu1 %v398_v15 }
 0x347   :  { %v400_v16 = vpop.xlane.xlu1 %399 }
 0x348   :  { %v401_v17 = vsub.f32 %v394_v13, %v400_v16 }
 0x34a   :  { %v402_v18 = vmul.f32 1.442695, %v401_v17 }
 0x34c   :  { %629 = vpow2.f32 %v402_v18 }
 0x356   :  { %v630_v19 = vpop.eup %629 }
 0x357   :  { %v404_v20 = vsel %vm397_vm3, %v630_v19, 0.0 }
 0x358   :  { %405 = vadd.xlane.f32.xlu1 %v404_v20 }
 0x3e5   :  { %v406_v21 = vpop.xlane.xlu1 %405 }
 0x3e6   :  { %631 = vlog2.f32 %v406_v21 }
 0x3f0   :  { %v632_v22 = vpop.eup %631 }
 0x3f1   :  { %v408_v23 = vmul.f32 0.6931472, %v632_v22 }
 0x3f3   :  { %v409_v24 = vadd.f32 %v408_v23, %v400_v16 }
 0x3f5   :  { %v410_v25 = vsub.f32 %v394_v13, %v409_v24 }
 0x3f7   :  { %411 = vst [vmem:[#allocation2] sm:$0x3] %v410_v25 }
 0x3f8   :  { %644 = shalt.err (!%p641_p4)
}
 0x3f9   :  { %s645_s12 = scalar_lea.hbm %s871_s7, 32 }
 0x3fa   :  { %p646_p5 = scmp.ne.s32.totalorder %s871_s7, %s645_s12  ;;  %p649_p6 = scmp.lt.u32.totalorder %s645_s12, %s871_s7 }
 0x3fc   :  { %p651_p7 = pnand %p649_p6, %p646_p5 }
 0x3fe   :  { %654 = shalt.err (!%p651_p7)
}
 0x3ff   :  { %421 = dma.vmem_to_hbm [thread:$0]  %s419_s9, 32, %s871_s7, [#allocation3]  }
 0x400   :  { %655 = dma.done.wait [#allocation3], 32  }
 0x401   :  { %656 = vsyncadd [#allocation3], 4294967264 }
 0x402   :  { %425 = vsyncpa [#allocation3], 1 }

</bundles_post_ra>
